<compile_context>
chip_gen: v6e
topology: v6e:2x2x1
jax: 0.10.0
libtpu: 0.0.40
codegen_flags: <defaults>
</compile_context>

<pallas_src>
import math

import jax
import jax.numpy as jnp
from jax.experimental import pallas as pl
from jax.experimental.pallas import tpu as pltpu  # noqa: F401  (TPU backend)

hidden_size = 20
input_size = 10
num_classes = 2
num_layers = 2  # the kernel hard-codes 2 stacked tanh-RNN layers


def _rnn_kernel(x_ref, w_in_ref, w_rec_ref, b0_ref, b1_ref, w_fc_ref,
                b_fc_ref, out_ref):
    T, B, I = x_ref.shape
    H2 = w_rec_ref.shape[0]            # 2*H : fused [layer-0 | layer-1] state

    # --- Hoisted input projection: one MXU push covers all T steps. ---------
    # w_in = [Wih0^T | 0], so lanes [H, 2H) of xz are exactly zero.
    x2d = x_ref[...].reshape(T * B, I)
    xz = jnp.dot(x2d, w_in_ref[...],
                 preferred_element_type=jnp.float32).reshape(T, B, H2)

    b0 = b0_ref[...]                   # (1, 2H): [b_ih0 + b_hh0 | 0]
    b1 = b1_ref[...]                   # (1, 2H): [0 | b_ih1 + b_hh1]
    b01 = b0 + b1

    # Per-step addend slab: add[t] = [xproj(t) + b0 | b1]  (one-time add).
    add = xz + b01                     # (T, B, 2H)

    w_rec = w_rec_ref[...]             # (2H,2H): [[Whh0^T, Wih1^T],[0, Whh1^T]]

    # --- Fill: s = [h0(0) | h1(-1) = 0]. -------------------------------------
    s = jnp.tanh(xz[0] + b0)           # second half: tanh(0 + 0) = 0

    # --- Skewed fused recurrence: [h0(t)|h1(t-1)] -> [h0(t+1)|h1(t)]. --------
    # Serial chain per step: 1 MXU dot + 1 VALU add + 1 EUP tanh.
    # T is small & static -> fully unrolled; slab reads are static slices.
    # TODO(synk): for large T switch to lax.fori_loop(..., unroll=4..8) and
    # consider pltpu.matmul_push_rhs to keep w_rec resident in the MXU.
    for t in range(T - 1):
        s = jnp.tanh(
            jnp.dot(s, w_rec, preferred_element_type=jnp.float32) + add[t + 1])

    # --- Drain: one more fused step; only the layer-1 half is meaningful. ----
    s = jnp.tanh(jnp.dot(s, w_rec, preferred_element_type=jnp.float32) + b01)
    # s[:, H:2H] == h1(T-1); the layer-0 half is ignored by the padded fc.

    # --- fc head: w_fc rows [0, H) are zero, so no lane slice is needed. -----
    out_ref[...] = (
        jnp.dot(s, w_fc_ref[...], preferred_element_type=jnp.float32)
        + b_fc_ref[...]).astype(out_ref.dtype)


def rnn_forward(x_btI, params):
    """x_btI: (B, T, I) float32, batch-first like the PyTorch module."""
    B, T, I = x_btI.shape
    H = params["whh0"].shape[0]
    C = params["wfc_t"].shape[1]
    H2 = 2 * H

    # Layout plumbing only (no wrapper-side compute): time-major x so each
    # step's addend is a contiguous (B, 2H) tile inside the kernel.
    x_tbi = jnp.transpose(x_btI, (1, 0, 2))

    # Input projection weight: [Wih0^T | 0]  (I, 2H).
    w_in = jnp.zeros((I, H2), jnp.float32).at[:, :H].set(params["wih0"].T)

    # Fused recurrent weight for the skewed two-layer update.
    w_rec = jnp.zeros((H2, H2), jnp.float32)
    w_rec = w_rec.at[:H, :H].set(params["whh0"].T)
    w_rec = w_rec.at[:H, H:].set(params["wih1"].T)
    w_rec = w_rec.at[H:, H:].set(params["whh1"].T)

    b0 = jnp.zeros((1, H2), jnp.float32).at[0, :H].set(
        params["bih0"] + params["bhh0"])
    b1 = jnp.zeros((1, H2), jnp.float32).at[0, H:].set(
        params["bih1"] + params["bhh1"])

    # fc reads only the layer-1 half of the fused state.
    w_fc = jnp.zeros((H2, C), jnp.float32).at[H:, :].set(params["wfc_t"])
    b_fc = params["bfc"].reshape(1, C)

    # Single gridless invocation: every operand is one full VMEM-resident
    # block (a few KB total — VMEM is a non-issue on all generations here).
    # TODO(synk): at large B/T, add a "parallel" batch grid axis (2nd TC on
    # v7x) and chunk T against v7x's 64 MiB VMEM with Buffered(2) streaming.
    return pl.pallas_call(
        _rnn_kernel,
        out_shape=jax.ShapeDtypeStruct((B, C), jnp.float32),
    )(x_tbi, w_in, w_rec, b0, b1, w_fc, b_fc)


def init_params(key, I, H, C):
    """Deterministic init mimicking PyTorch's U(-1/sqrt(H), 1/sqrt(H))."""
    bound = 1.0 / math.sqrt(H)
    ks = jax.random.split(key, 11)
    u = lambda k, shape: jax.random.uniform(k, shape, jnp.float32, -bound, bound)
    return {
        # nn.RNN layer 0
        "wih0": u(ks[0], (H, I)), "whh0": u(ks[1], (H, H)),
        "bih0": u(ks[2], (H,)),   "bhh0": u(ks[3], (H,)),
        # nn.RNN layer 1
        "wih1": u(ks[4], (H, H)), "whh1": u(ks[5], (H, H)),
        "bih1": u(ks[6], (H,)),   "bhh1": u(ks[7], (H,)),
        # nn.Linear(H, C) — stored already transposed (H, C)
        "wfc_t": u(ks[8], (C, H)).T, "bfc": u(ks[9], (C,)),
    }


def rnn_forward_ref(x, p):
    """Pure-JAX reference of the PyTorch forward, for correctness checking."""
    B, T, I = x.shape
    H = p["whh0"].shape[0]
    h0 = jnp.zeros((B, H), jnp.float32)
    h1 = jnp.zeros((B, H), jnp.float32)
    for t in range(T):
        xt = x[:, t, :]
        h0 = jnp.tanh(xt @ p["wih0"].T + p["bih0"] + h0 @ p["whh0"].T + p["bhh0"])
        h1 = jnp.tanh(h0 @ p["wih1"].T + p["bih1"] + h1 @ p["whh1"].T + p["bhh1"])
    return h1 @ p["wfc_t"] + p["bfc"]


if __name__ == "__main__":
    B, T = 8, 8
    key = jax.random.PRNGKey(0)
    kx, kp = jax.random.split(key)
    x = jax.random.normal(kx, (B, T, input_size), jnp.float32)
    params = init_params(kp, input_size, hidden_size, num_classes)

    out = rnn_forward(x, params)
    out = jax.block_until_ready(out)

    ref = rnn_forward_ref(x, params)
    assert out.shape == (B, num_classes)
    assert jnp.allclose(out, ref, atol=1e-5, rtol=1e-5), (out, ref)
    print("KERNEL_OK")
</pallas_src>

<mosaic_0001>
module attributes {stable_mosaic.version = 11 : i64} {
  func.func @_rnn_kernel(%arg0: memref<8x8x10xf32, #tpu.memory_space<vmem>>, %arg1: memref<10x40xf32, #tpu.memory_space<vmem>>, %arg2: memref<40x40xf32, #tpu.memory_space<vmem>>, %arg3: memref<1x40xf32, #tpu.memory_space<vmem>>, %arg4: memref<1x40xf32, #tpu.memory_space<vmem>>, %arg5: memref<40x2xf32, #tpu.memory_space<vmem>>, %arg6: memref<1x2xf32, #tpu.memory_space<vmem>>, %arg7: memref<8x2xf32, #tpu.memory_space<vmem>>) attributes {dimension_semantics = [], scalar_prefetch = 0 : i64, scratch_operands = 0 : i64, tpu.core_type = #tpu.core_type<tc>} {
    %c0 = arith.constant 0 : index
    %c0_0 = arith.constant 0 : index
    %c0_1 = arith.constant 0 : index
    %0 = vector.load %arg0[%c0, %c0_0, %c0_1] : memref<8x8x10xf32, #tpu.memory_space<vmem>>, vector<8x8x10xf32>
    %1 = vector.shape_cast %0 : vector<8x8x10xf32> to vector<64x10xf32>
    %c0_2 = arith.constant 0 : index
    %c0_3 = arith.constant 0 : index
    %2 = vector.load %arg1[%c0_2, %c0_3] : memref<10x40xf32, #tpu.memory_space<vmem>>, vector<10x40xf32>
    %cst = arith.constant dense<0.000000e+00> : vector<64x40xf32>
    %3 = tpu.matmul %1, %2, %cst {dimension_numbers = #tpu.dot_dimension_numbers<[1], [0], [0], [1], [0, 0, 1, 1], [], []>} : vector<64x10xf32>, vector<10x40xf32>, vector<64x40xf32> -> vector<64x40xf32>
    %4 = vector.shape_cast %3 : vector<64x40xf32> to vector<8x8x40xf32>
    %c0_4 = arith.constant 0 : index
    %c0_5 = arith.constant 0 : index
    %5 = vector.load %arg3[%c0_4, %c0_5] : memref<1x40xf32, #tpu.memory_space<vmem>>, vector<1x40xf32>
    %c0_6 = arith.constant 0 : index
    %c0_7 = arith.constant 0 : index
    %6 = vector.load %arg4[%c0_6, %c0_7] : memref<1x40xf32, #tpu.memory_space<vmem>>, vector<1x40xf32>
    %7 = arith.addf %5, %6 : vector<1x40xf32>
    %8 = vector.shape_cast %7 : vector<1x40xf32> to vector<1x1x40xf32>
    %9 = vector.broadcast %8 : vector<1x1x40xf32> to vector<8x8x40xf32>
    %10 = arith.addf %4, %9 : vector<8x8x40xf32>
    %c0_8 = arith.constant 0 : index
    %c0_9 = arith.constant 0 : index
    %11 = vector.load %arg2[%c0_8, %c0_9] : memref<40x40xf32, #tpu.memory_space<vmem>>, vector<40x40xf32>
    %12 = vector.extract_strided_slice %4 {offsets = [0, 0, 0], sizes = [1, 8, 40], strides = [1, 1, 1]} : vector<8x8x40xf32> to vector<1x8x40xf32>
    %13 = vector.shape_cast %12 : vector<1x8x40xf32> to vector<8x40xf32>
    %14 = vector.broadcast %5 : vector<1x40xf32> to vector<8x40xf32>
    %15 = arith.addf %13, %14 : vector<8x40xf32>
    %16 = math.tanh %15 : vector<8x40xf32>
    %cst_10 = arith.constant dense<0.000000e+00> : vector<8x40xf32>
    %17 = tpu.matmul %16, %11, %cst_10 {dimension_numbers = #tpu.dot_dimension_numbers<[1], [0], [0], [1], [0, 0, 1, 1], [], []>} : vector<8x40xf32>, vector<40x40xf32>, vector<8x40xf32> -> vector<8x40xf32>
    %18 = vector.extract_strided_slice %10 {offsets = [1, 0, 0], sizes = [1, 8, 40], strides = [1, 1, 1]} : vector<8x8x40xf32> to vector<1x8x40xf32>
    %19 = vector.shape_cast %18 : vector<1x8x40xf32> to vector<8x40xf32>
    %20 = arith.addf %17, %19 : vector<8x40xf32>
    %21 = math.tanh %20 : vector<8x40xf32>
    %cst_11 = arith.constant dense<0.000000e+00> : vector<8x40xf32>
    %22 = tpu.matmul %21, %11, %cst_11 {dimension_numbers = #tpu.dot_dimension_numbers<[1], [0], [0], [1], [0, 0, 1, 1], [], []>} : vector<8x40xf32>, vector<40x40xf32>, vector<8x40xf32> -> vector<8x40xf32>
    %23 = vector.extract_strided_slice %10 {offsets = [2, 0, 0], sizes = [1, 8, 40], strides = [1, 1, 1]} : vector<8x8x40xf32> to vector<1x8x40xf32>
    %24 = vector.shape_cast %23 : vector<1x8x40xf32> to vector<8x40xf32>
    %25 = arith.addf %22, %24 : vector<8x40xf32>
    %26 = math.tanh %25 : vector<8x40xf32>
    %cst_12 = arith.constant dense<0.000000e+00> : vector<8x40xf32>
    %27 = tpu.matmul %26, %11, %cst_12 {dimension_numbers = #tpu.dot_dimension_numbers<[1], [0], [0], [1], [0, 0, 1, 1], [], []>} : vector<8x40xf32>, vector<40x40xf32>, vector<8x40xf32> -> vector<8x40xf32>
    %28 = vector.extract_strided_slice %10 {offsets = [3, 0, 0], sizes = [1, 8, 40], strides = [1, 1, 1]} : vector<8x8x40xf32> to vector<1x8x40xf32>
    %29 = vector.shape_cast %28 : vector<1x8x40xf32> to vector<8x40xf32>
    %30 = arith.addf %27, %29 : vector<8x40xf32>
    %31 = math.tanh %30 : vector<8x40xf32>
    %cst_13 = arith.constant dense<0.000000e+00> : vector<8x40xf32>
    %32 = tpu.matmul %31, %11, %cst_13 {dimension_numbers = #tpu.dot_dimension_numbers<[1], [0], [0], [1], [0, 0, 1, 1], [], []>} : vector<8x40xf32>, vector<40x40xf32>, vector<8x40xf32> -> vector<8x40xf32>
    %33 = vector.extract_strided_slice %10 {offsets = [4, 0, 0], sizes = [1, 8, 40], strides = [1, 1, 1]} : vector<8x8x40xf32> to vector<1x8x40xf32>
    %34 = vector.shape_cast %33 : vector<1x8x40xf32> to vector<8x40xf32>
    %35 = arith.addf %32, %34 : vector<8x40xf32>
    %36 = math.tanh %35 : vector<8x40xf32>
    %cst_14 = arith.constant dense<0.000000e+00> : vector<8x40xf32>
    %37 = tpu.matmul %36, %11, %cst_14 {dimension_numbers = #tpu.dot_dimension_numbers<[1], [0], [0], [1], [0, 0, 1, 1], [], []>} : vector<8x40xf32>, vector<40x40xf32>, vector<8x40xf32> -> vector<8x40xf32>
    %38 = vector.extract_strided_slice %10 {offsets = [5, 0, 0], sizes = [1, 8, 40], strides = [1, 1, 1]} : vector<8x8x40xf32> to vector<1x8x40xf32>
    %39 = vector.shape_cast %38 : vector<1x8x40xf32> to vector<8x40xf32>
    %40 = arith.addf %37, %39 : vector<8x40xf32>
    %41 = math.tanh %40 : vector<8x40xf32>
    %cst_15 = arith.constant dense<0.000000e+00> : vector<8x40xf32>
    %42 = tpu.matmul %41, %11, %cst_15 {dimension_numbers = #tpu.dot_dimension_numbers<[1], [0], [0], [1], [0, 0, 1, 1], [], []>} : vector<8x40xf32>, vector<40x40xf32>, vector<8x40xf32> -> vector<8x40xf32>
    %43 = vector.extract_strided_slice %10 {offsets = [6, 0, 0], sizes = [1, 8, 40], strides = [1, 1, 1]} : vector<8x8x40xf32> to vector<1x8x40xf32>
    %44 = vector.shape_cast %43 : vector<1x8x40xf32> to vector<8x40xf32>
    %45 = arith.addf %42, %44 : vector<8x40xf32>
    %46 = math.tanh %45 : vector<8x40xf32>
    %cst_16 = arith.constant dense<0.000000e+00> : vector<8x40xf32>
    %47 = tpu.matmul %46, %11, %cst_16 {dimension_numbers = #tpu.dot_dimension_numbers<[1], [0], [0], [1], [0, 0, 1, 1], [], []>} : vector<8x40xf32>, vector<40x40xf32>, vector<8x40xf32> -> vector<8x40xf32>
    %48 = vector.extract_strided_slice %10 {offsets = [7, 0, 0], sizes = [1, 8, 40], strides = [1, 1, 1]} : vector<8x8x40xf32> to vector<1x8x40xf32>
    %49 = vector.shape_cast %48 : vector<1x8x40xf32> to vector<8x40xf32>
    %50 = arith.addf %47, %49 : vector<8x40xf32>
    %51 = math.tanh %50 : vector<8x40xf32>
    %cst_17 = arith.constant dense<0.000000e+00> : vector<8x40xf32>
    %52 = tpu.matmul %51, %11, %cst_17 {dimension_numbers = #tpu.dot_dimension_numbers<[1], [0], [0], [1], [0, 0, 1, 1], [], []>} : vector<8x40xf32>, vector<40x40xf32>, vector<8x40xf32> -> vector<8x40xf32>
    %53 = vector.broadcast %7 : vector<1x40xf32> to vector<8x40xf32>
    %54 = arith.addf %52, %53 : vector<8x40xf32>
    %55 = math.tanh %54 : vector<8x40xf32>
    %c0_18 = arith.constant 0 : index
    %c0_19 = arith.constant 0 : index
    %56 = vector.load %arg5[%c0_18, %c0_19] : memref<40x2xf32, #tpu.memory_space<vmem>>, vector<40x2xf32>
    %cst_20 = arith.constant dense<0.000000e+00> : vector<8x2xf32>
    %57 = tpu.matmul %55, %56, %cst_20 {dimension_numbers = #tpu.dot_dimension_numbers<[1], [0], [0], [1], [0, 0, 1, 1], [], []>} : vector<8x40xf32>, vector<40x2xf32>, vector<8x2xf32> -> vector<8x2xf32>
    %c0_21 = arith.constant 0 : index
    %c0_22 = arith.constant 0 : index
    %58 = vector.load %arg6[%c0_21, %c0_22] : memref<1x2xf32, #tpu.memory_space<vmem>>, vector<1x2xf32>
    %59 = vector.broadcast %58 : vector<1x2xf32> to vector<8x2xf32>
    %60 = arith.addf %57, %59 : vector<8x2xf32>
    %c0_23 = arith.constant 0 : index
    %c0_24 = arith.constant 0 : index
    %61 = vector.load %arg7[%c0_23, %c0_24] : memref<8x2xf32, #tpu.memory_space<vmem>>, vector<8x2xf32>
    tpu.vector_store %arg7[%c0_23, %c0_24], %60 {strides = array<i32>} : memref<8x2xf32, #tpu.memory_space<vmem>>, vector<8x2xf32>,
    return
  }
}

</mosaic_0001>

<bundles_post_ra>
// kernel: tpu_custom_call.1
= control target key start
LH: loop header
LB: loop body
LE: loop exit
PB: predicated region body
PF: predicated region fallthrough
CT: control target
= control target key end

     0   :  { %12 = vsyncpa [#allocation3], 0  ;;  %s1437_s0 = inlined_call_operand.hbm [shape: f32[8,8,10], index: 0, kind: input, shape index: {}]   ;;  %s1438_s1 = inlined_call_operand.hbm [shape: f32[10,40], index: 1, kind: input, shape index: {}]   ;;  %s1439_s2 = inlined_call_operand.vmem [shape: f32[40,40], index: 2, kind: input, shape index: {}]   ;;  %s1440_s3 = inlined_call_operand.vmem [shape: f32[1,40], index: 3, kind: input, shape index: {}]   ;;  %s1441_s4 = inlined_call_operand.vmem [shape: f32[1,40], index: 4, kind: input, shape index: {}]   ;;  %s1442_s5 = inlined_call_operand.vmem [shape: f32[40,2], index: 5, kind: input, shape index: {}]   ;;  %s1443_s6 = inlined_call_operand.vmem [shape: f32[1,2], index: 6, kind: input, shape index: {}]   ;;  %s1444_s7 = inlined_call_operand.vmem [shape: f32[8,2], index: 7, kind: output, shape index: {}]  }
   0x1   :  { %13 = vsyncpa [#allocation5], 0  ;;  %s1197_s24 = smov [#allocation2]  }
   0x2   :  { %s19_s25 = sshll.u32 %s1197_s24, 4  ;;  %s20_s25 = int_to_ptr.vmem [resolvable:$true] %s19_s25 }
   0x3   :  { %s1161_s26 = scalar_lea.vmem %s20_s25, 1024  ;;  %p1166_p1 = scmp.lt.s32.totalorder %s20_s25, %s20_s25 }
   0x4   :  { %p1162_p0 = scmp.ne.s32.totalorder %s20_s25, %s1161_s26  ;;  %p1167_p2 = scmp.lt.s32.totalorder %s1161_s26, %s1161_s26 }
   0x6   :  { %p1168_p3 = por %p1167_p2, %p1166_p1 }
   0x8   :  { %p1169_p4 = pnand %p1168_p3, %p1162_p0 }
   0xa   :  { %1172 = shalt.err (!%p1169_p4)
}
   0xb   :  { %s1198_s27 = smov 128   ;;  %s1199_s28 = smov 8  }
   0xc   :  { %25 = dma.hbm_to_vmem [thread:$0]  %s1437_s0, 1024, %s20_s25, [#allocation3], %s1198_s27, %s1198_s27, %s1199_s28  }
   0xd   :  { %s1200_s8 = smov [#allocation4]  }
   0xe   :  { %s31_s9 = sshll.u32 %s1200_s8, 4  ;;  %s32_s9 = int_to_ptr.vmem [resolvable:$true] %s31_s9 }
   0xf   :  { %s1181_s10 = scalar_lea.vmem %s32_s9, 256  ;;  %p1186_p6 = scmp.lt.s32.totalorder %s32_s9, %s32_s9 }
  0x10   :  { %p1182_p5 = scmp.ne.s32.totalorder %s32_s9, %s1181_s10  ;;  %p1187_p7 = scmp.lt.s32.totalorder %s1181_s10, %s1181_s10 }
  0x12   :  { %p1188_p8 = por %p1187_p7, %p1186_p6 }
  0x14   :  { %p1189_p9 = pnand %p1188_p8, %p1182_p5 }
  0x16   :  { %1192 = shalt.err (!%p1189_p9)
}
  0x17   :  { %37 = dma.hbm_to_vmem [thread:$0]  %s1438_s1, 256, %s32_s9, [#allocation5], %s1198_s27, %s1198_s27, %s1199_s28  }
  0x18   :  { %1193 = dma.done.wait [#allocation3], 1024  }
  0x19   :  { %1194 = vsyncadd [#allocation3], 4294966272 }
  0x1a   :  { %1195 = dma.done.wait [#allocation5], 256  }
  0x1b   :  { %1196 = vsyncadd [#allocation5], 4294967040  ;;  %vm89_vm0 = vcmask 1041408   ;;  %vm64_vm1 = vcmask 80896   ;;  %v63_v0 = vld [vmem:[#allocation4 + $0x8] sm:$0x3]  ;;  %v202_v4 = vlaneseq }
  0x1c   :  { %v62_v1 = vld [vmem:[#allocation4] sm:$0xff]  ;;  %996 = vmatprep.subr.msk.mxu0 %vm89_vm0, %v63_v0  ;;  %v55_v3 = vld [vmem:[#allocation2 + $0x8] sm:$0xff]  ;;  %v1201_v12 = vmov 0.0   ;;  %v1268_v13 = vld [vmem:[%s1439_s2 + $0x18] sm:$0xff]  ;;  %vm1202_vm2 = vmmov 0   ;;  %vm227_vm3 = vcmask 326656  }
  0x1d   :  { %v54_v2 = vld [vmem:[#allocation2] sm:$0xff]  ;;  %997 = vmatpush3.msk.msra.mxu0 %vm89_vm0, %v63_v0  ;;  %v203_v5 = vshrl.u32 %v202_v4, 7  ;;  %1012 = vmatprep.subr.mxu1 %v1201_v12  ;;  %v1278_v14 = vld [vmem:[%s1439_s2 + $0x10] sm:$0xff]  ;;  %v1287_v15 = vld [vmem:[%s1439_s2 + $0x8] sm:$0xff]  ;;  %vm905_vm4 = vcmask 15360  }
  0x1e   :  { %1000 = vmatprep.mubr.msk.f32.mxu0 %vm64_vm1, %v54_v2  ;;  %998 = vmatprep.subr.mxu0 %v62_v1  ;;  %v198_v6 = vld [vmem:[%s1440_s3] sm:$0x1]  ;;  %v56_v22 = vld [vmem:[#allocation2 + $0x10] sm:$0xff]  ;;  %v57_v23 = vld [vmem:[#allocation2 + $0x18] sm:$0xff] }
  0x1f   :  { %999 = vmatpush3.msra.mxu0 %v62_v1  ;;  %v199_v7 = vld [vmem:[%s1441_s4] sm:$0x1]  ;;  %v204_v9 = vsub.s32 0, %v203_v5  ;;  %1022 = vmatprep.mubr.msk.f32.mxu1 %vm1202_vm2, %v1201_v12  ;;  %v59_v25 = vld [vmem:[#allocation2 + $0x28] sm:$0xff]  ;;  %v60_v26 = vld [vmem:[#allocation2 + $0x30] sm:$0xff] }
  0x20   :  { %1001 = vmatmul.mubr.msk.f32.vlgmr.msra.gmra.mxu0 %vm64_vm1, %v55_v3  ;;  %v200_v8 = vadd.f32 %v199_v7, %v198_v6  ;;  %v1262_v11 = vld [vmem:[%s1439_s2 + $0x20] sm:$0xff]  ;;  %1025 = vmatprep.subr.mxu0 %v1201_v12  ;;  %v61_v27 = vld [vmem:[#allocation2 + $0x38] sm:$0xff]  ;;  %v822_v7 = vld [vmem:[%s1442_s5 + $0x10] sm:$0xff] }
  0x21   :  { %1013 = vmatpush3.msra.mxu1 %v1262_v11  ;;  %1026 = vmatpush3.msra.mxu0 %v1262_v11  ;;  %v1296_v16 = vld [vmem:[%s1439_s2] sm:$0xff]  ;;  %v223_v17 = vrot.slane %v198_v6, %v204_v9  ;;  %v823_v6 = vld [vmem:[%s1442_s5 + $0x18] sm:$0xff] }
  0x22   :  { %v1257_v10 = vrot.slane %v200_v8, %v204_v9  ;;  %1014 = vmatprep.subr.mxu1 %v1201_v12  ;;  %1027 = vmatprep.subr.mxu0 %v1201_v12  ;;  %v58_v24 = vld [vmem:[#allocation2 + $0x20] sm:$0xff]  ;;  %v821_v8 = vld [vmem:[%s1442_s5 + $0x8] sm:$0xff] }
  0x23   :  { %1015 = vmatpush3.msra.mxu1 %v1268_v13  ;;  %1028 = vmatpush3.msra.mxu0 %v1268_v13  ;;  %v824_v5 = vld [vmem:[%s1442_s5 + $0x20] sm:$0xff] }
  0x24   :  { %1016 = vmatprep.subr.mxu1 %v1201_v12  ;;  %1029 = vmatprep.subr.mxu0 %v1201_v12  ;;  %v820_v9 = vld [vmem:[%s1442_s5] sm:$0xff] }
  0x25   :  { %1017 = vmatpush3.msra.mxu1 %v1278_v14  ;;  %1030 = vmatpush3.msra.mxu0 %v1278_v14 }
  0x26   :  { %1018 = vmatprep.subr.mxu1 %v1201_v12  ;;  %1031 = vmatprep.subr.mxu0 %v1201_v12 }
  0x27   :  { %1019 = vmatpush3.msra.mxu1 %v1287_v15  ;;  %1032 = vmatpush3.msra.mxu0 %v1287_v15 }
  0x28   :  { %1020 = vmatprep.subr.mxu1 %v1201_v12  ;;  %1033 = vmatprep.subr.mxu0 %v1201_v12 }
  0x29   :  { %1021 = vmatpush3.msra.mxu1 %v1296_v16  ;;  %1034 = vmatpush3.msra.mxu0 %v1296_v16 }
  0x2a   :  { %1038 = vmatprep.subr.mxu1 %v1201_v12  ;;  %1051 = vmatprep.subr.mxu0 %v1201_v12 }
  0x2b   :  { %1003 = vmatprep.mubr.msk.f32.mxu0 %vm64_vm1, %v56_v22 }
  0x2c   :  { %1004 = vmatmul.mubr.msk.f32.gmra.mxu0 %vm64_vm1, %v57_v23 }
  0x2d   :  { %1006 = vmatprep.mubr.msk.f32.mxu0 %vm64_vm1, %v58_v24 }
  0x30   :  { %1007 = vmatmul.mubr.msk.f32.gmra.mxu0 %vm64_vm1, %v59_v25 }
  0x31   :  { %1009 = vmatprep.mubr.msk.f32.mxu0 %vm64_vm1, %v60_v26 }
  0x34   :  { %1010 = vmatmul.mubr.msk.f32.gmra.mxu0 %vm64_vm1, %v61_v27 }
  0x35   :  { %1035 = vmatprep.mubr.msk.f32.mxu0 %vm1202_vm2, %v1201_v12 }
  0xe0   :  { %v1002_v18 = vpop.f32.mrf.mxu0 }
  0xe1   :  { %v207_v28 = vadd.f32 %v1002_v18, %v1257_v10 }
  0xe2   :  { %v159_v19 = vpop.f32.mrf.mxu0 }
  0xe3   :  { %v225_v20 = vadd.f32 %v223_v17, %v159_v19 }
  0xe5   :  { %1135 = vtanh.f32 %v225_v20 }
  0xec   :  { %v1005_v33 = vpop.f32.mrf.mxu0 }
  0xed   :  { %v209_v44 = vadd.f32 %v1005_v33, %v1257_v10 }
  0xee   :  { %v169_v34 = vpop.f32.mrf.mxu0 }
  0xef   :  { %v208_v39 = vadd.f32 %v1257_v10, %v169_v34 }
  0xf0   :  { %v1008_v35 = vpop.f32.mrf.mxu0 }
  0xf1   :  { %v211_v54 = vadd.f32 %v1008_v35, %v1257_v10 }
  0xf2   :  { %v1136_v21 = vpop.eup %1135  ;;  %v179_v36 = vpop.f32.mrf.mxu0 }
  0xf3   :  { %1023 = vmatmul.mubr.msk.f32.vlgmr.msra.gmra.mxu1 %vm227_vm3, %v1136_v21  ;;  %v210_v49 = vadd.f32 %v1257_v10, %v179_v36 }
  0xf4   :  { %1039 = vmatpush3.msra.mxu1 %v1262_v11  ;;  %1048 = vmatprep.mubr.msk.f32.mxu1 %vm1202_vm2, %v1201_v12  ;;  %v1343_v37 = vpop.f32.mrf.mxu0 }
  0xf5   :  { %1040 = vmatprep.subr.mxu1 %v1201_v12  ;;  %v213_v0 = vadd.f32 %v1343_v37, %v1257_v10 }
  0xf6   :  { %1041 = vmatpush3.msra.mxu1 %v1268_v13  ;;  %v1345_v38 = vpop.f32.mrf.mxu0 }
  0xf7   :  { %1042 = vmatprep.subr.mxu1 %v1201_v12  ;;  %v212_v59 = vadd.f32 %v1257_v10, %v1345_v38 }
  0xf8   :  { %1043 = vmatpush3.msra.mxu1 %v1278_v14 }
  0xf9   :  { %1044 = vmatprep.subr.mxu1 %v1201_v12 }
  0xfa   :  { %1045 = vmatpush3.msra.mxu1 %v1287_v15 }
  0xfb   :  { %1046 = vmatprep.subr.mxu1 %v1201_v12 }
  0xfc   :  { %1047 = vmatpush3.msra.mxu1 %v1296_v16 }
  0xfd   :  { %1064 = vmatprep.subr.mxu1 %v1201_v12 }
 0x1b3   :  { %v297_v29 = vpop.f32.mrf.mxu1 }
 0x1b4   :  { %v298_v30 = vadd.f32 %v297_v29, %v207_v28 }
 0x1b5   :  { %v1024_v31 = vpop.f32.mrf.mxu1 }
 0x1b6   :  { %1137 = vtanh.f32 %v298_v30 }
 0x1c3   :  { %v1138_v32 = vpop.eup %1137 }
 0x1c4   :  { %1036 = vmatmul.mubr.msk.f32.vlgmr.msra.gmra.mxu0 %vm227_vm3, %v1138_v32 }
 0x1c5   :  { %1052 = vmatpush3.msra.mxu0 %v1262_v11  ;;  %1061 = vmatprep.mubr.msk.f32.mxu0 %vm1202_vm2, %v1201_v12 }
 0x1c6   :  { %1053 = vmatprep.subr.mxu0 %v1201_v12 }
 0x1c7   :  { %1054 = vmatpush3.msra.mxu0 %v1268_v13 }
 0x1c8   :  { %1055 = vmatprep.subr.mxu0 %v1201_v12 }
 0x1c9   :  { %1056 = vmatpush3.msra.mxu0 %v1278_v14 }
 0x1ca   :  { %1057 = vmatprep.subr.mxu0 %v1201_v12 }
 0x1cb   :  { %1058 = vmatpush3.msra.mxu0 %v1287_v15 }
 0x1cc   :  { %1059 = vmatprep.subr.mxu0 %v1201_v12 }
 0x1cd   :  { %1060 = vmatpush3.msra.mxu0 %v1296_v16 }
 0x1ce   :  { %1077 = vmatprep.subr.mxu0 %v1201_v12 }
 0x284   :  { %v371_v40 = vpop.f32.mrf.mxu0 }
 0x285   :  { %v372_v41 = vadd.f32 %v371_v40, %v208_v39 }
 0x286   :  { %v1037_v42 = vpop.f32.mrf.mxu0 }
 0x287   :  { %1139 = vtanh.f32 %v372_v41 }
 0x294   :  { %v1140_v43 = vpop.eup %1139 }
 0x295   :  { %1049 = vmatmul.mubr.msk.f32.vlgmr.msra.gmra.mxu1 %vm227_vm3, %v1140_v43 }
 0x296   :  { %1065 = vmatpush3.msra.mxu1 %v1262_v11  ;;  %1074 = vmatprep.mubr.msk.f32.mxu1 %vm1202_vm2, %v1201_v12 }
 0x297   :  { %1066 = vmatprep.subr.mxu1 %v1201_v12 }
 0x298   :  { %1067 = vmatpush3.msra.mxu1 %v1268_v13 }
 0x299   :  { %1068 = vmatprep.subr.mxu1 %v1201_v12 }
 0x29a   :  { %1069 = vmatpush3.msra.mxu1 %v1278_v14 }
 0x29b   :  { %1070 = vmatprep.subr.mxu1 %v1201_v12 }
 0x29c   :  { %1071 = vmatpush3.msra.mxu1 %v1287_v15 }
 0x29d   :  { %1072 = vmatprep.subr.mxu1 %v1201_v12 }
 0x29e   :  { %1073 = vmatpush3.msra.mxu1 %v1296_v16 }
 0x29f   :  { %1090 = vmatprep.subr.mxu1 %v1201_v12 }
 0x355   :  { %v445_v45 = vpop.f32.mrf.mxu1 }
 0x356   :  { %v446_v46 = vadd.f32 %v445_v45, %v209_v44 }
 0x357   :  { %v1050_v47 = vpop.f32.mrf.mxu1 }
 0x358   :  { %1141 = vtanh.f32 %v446_v46 }
 0x365   :  { %v1142_v48 = vpop.eup %1141 }
 0x366   :  { %1062 = vmatmul.mubr.msk.f32.vlgmr.msra.gmra.mxu0 %vm227_vm3, %v1142_v48 }
 0x367   :  { %1078 = vmatpush3.msra.mxu0 %v1262_v11  ;;  %1087 = vmatprep.mubr.msk.f32.mxu0 %vm1202_vm2, %v1201_v12 }
 0x368   :  { %1079 = vmatprep.subr.mxu0 %v1201_v12 }
 0x369   :  { %1080 = vmatpush3.msra.mxu0 %v1268_v13 }
 0x36a   :  { %1081 = vmatprep.subr.mxu0 %v1201_v12 }
 0x36b   :  { %1082 = vmatpush3.msra.mxu0 %v1278_v14 }
 0x36c   :  { %1083 = vmatprep.subr.mxu0 %v1201_v12 }
 0x36d   :  { %1084 = vmatpush3.msra.mxu0 %v1287_v15 }
 0x36e   :  { %1085 = vmatprep.subr.mxu0 %v1201_v12 }
 0x36f   :  { %1086 = vmatpush3.msra.mxu0 %v1296_v16 }
 0x370   :  { %1103 = vmatprep.subr.mxu0 %v1201_v12 }
 0x426   :  { %v519_v50 = vpop.f32.mrf.mxu0 }
 0x427   :  { %v520_v51 = vadd.f32 %v519_v50, %v210_v49 }
 0x428   :  { %v1063_v52 = vpop.f32.mrf.mxu0 }
 0x429   :  { %1143 = vtanh.f32 %v520_v51 }
 0x436   :  { %v1144_v53 = vpop.eup %1143 }
 0x437   :  { %1075 = vmatmul.mubr.msk.f32.vlgmr.msra.gmra.mxu1 %vm227_vm3, %v1144_v53 }
 0x438   :  { %1091 = vmatpush3.msra.mxu1 %v1262_v11  ;;  %1100 = vmatprep.mubr.msk.f32.mxu1 %vm1202_vm2, %v1201_v12 }
 0x439   :  { %1092 = vmatprep.subr.mxu1 %v1201_v12 }
 0x43a   :  { %1093 = vmatpush3.msra.mxu1 %v1268_v13 }
 0x43b   :  { %1094 = vmatprep.subr.mxu1 %v1201_v12 }
 0x43c   :  { %1095 = vmatpush3.msra.mxu1 %v1278_v14 }
 0x43d   :  { %1096 = vmatprep.subr.mxu1 %v1201_v12 }
 0x43e   :  { %1097 = vmatpush3.msra.mxu1 %v1287_v15 }
 0x43f   :  { %1098 = vmatprep.subr.mxu1 %v1201_v12 }
 0x440   :  { %1099 = vmatpush3.msra.mxu1 %v1296_v16 }
 0x441   :  { %1116 = vmatprep.subr.mxu1 %v1201_v12 }
 0x4f7   :  { %v593_v55 = vpop.f32.mrf.mxu1 }
 0x4f8   :  { %v594_v56 = vadd.f32 %v593_v55, %v211_v54 }
 0x4f9   :  { %v1076_v57 = vpop.f32.mrf.mxu1 }
 0x4fa   :  { %1145 = vtanh.f32 %v594_v56 }
 0x507   :  { %v1146_v58 = vpop.eup %1145 }
 0x508   :  { %1088 = vmatmul.mubr.msk.f32.vlgmr.msra.gmra.mxu0 %vm227_vm3, %v1146_v58 }
 0x509   :  { %1104 = vmatpush3.msra.mxu0 %v1262_v11  ;;  %1113 = vmatprep.mubr.msk.f32.mxu0 %vm1202_vm2, %v1201_v12 }
 0x50a   :  { %1105 = vmatprep.subr.mxu0 %v1201_v12 }
 0x50b   :  { %1106 = vmatpush3.msra.mxu0 %v1268_v13 }
 0x50c   :  { %1107 = vmatprep.subr.mxu0 %v1201_v12 }
 0x50d   :  { %1108 = vmatpush3.msra.mxu0 %v1278_v14 }
 0x50e   :  { %1109 = vmatprep.subr.mxu0 %v1201_v12 }
 0x50f   :  { %1110 = vmatpush3.msra.mxu0 %v1287_v15 }
 0x510   :  { %1111 = vmatprep.subr.mxu0 %v1201_v12 }
 0x511   :  { %1112 = vmatpush3.msra.mxu0 %v1296_v16  ;;  %v930_v16 = vld [vmem:[%s1443_s6] ss:$0 sm:$0xff] }
 0x5c8   :  { %v667_v60 = vpop.f32.mrf.mxu0 }
 0x5c9   :  { %v668_v61 = vadd.f32 %v667_v60, %v212_v59 }
 0x5ca   :  { %v1089_v62 = vpop.f32.mrf.mxu0 }
 0x5cb   :  { %1147 = vtanh.f32 %v668_v61 }
 0x5d8   :  { %v1148_v63 = vpop.eup %1147 }
 0x5d9   :  { %1101 = vmatmul.mubr.msk.f32.vlgmr.msra.gmra.mxu1 %vm227_vm3, %v1148_v63 }
 0x5da   :  { %1126 = vmatprep.mubr.msk.f32.mxu1 %vm1202_vm2, %v1201_v12  ;;  %1117 = vmatpush3.msra.mxu1 %v824_v5 }
 0x5db   :  { %1118 = vmatprep.subr.mxu1 %v1201_v12 }
 0x5dc   :  { %1119 = vmatpush3.msra.mxu1 %v823_v6 }
 0x5dd   :  { %1120 = vmatprep.subr.mxu1 %v1201_v12 }
 0x5de   :  { %1121 = vmatpush3.msra.mxu1 %v822_v7 }
 0x5df   :  { %1122 = vmatprep.subr.mxu1 %v1201_v12 }
 0x5e0   :  { %1123 = vmatpush3.msra.mxu1 %v821_v8 }
 0x5e1   :  { %1124 = vmatprep.subr.mxu1 %v1201_v12 }
 0x5e2   :  { %1125 = vmatpush3.msra.mxu1 %v820_v9 }
 0x699   :  { %v741_v1 = vpop.f32.mrf.mxu1 }
 0x69a   :  { %v742_v2 = vadd.f32 %v741_v1, %v213_v0 }
 0x69b   :  { %v1102_v3 = vpop.f32.mrf.mxu1 }
 0x69c   :  { %1149 = vtanh.f32 %v742_v2 }
 0x6a9   :  { %v1150_v4 = vpop.eup %1149 }
 0x6aa   :  { %1114 = vmatmul.mubr.msk.f32.vlgmr.msra.gmra.mxu0 %vm227_vm3, %v1150_v4 }
 0x76a   :  { %v815_v11 = vpop.f32.mrf.mxu0 }
 0x76b   :  { %v816_v13 = vadd.f32 %v815_v11, %v1257_v10 }
 0x76c   :  { %v1115_v14 = vpop.f32.mrf.mxu0 }
 0x76d   :  { %1151 = vtanh.f32 %v816_v13 }
 0x77a   :  { %v1152_v15 = vpop.eup %1151 }
 0x77b   :  { %1127 = vmatmul.mubr.msk.f32.vlgmr.msra.gmra.mxu1 %vm227_vm3, %v1152_v15 }
 0x83b   :  { %v901_v17 = vpop.f32.mrf.mxu1 }
 0x83c   :  { %v902_v18 = vadd.f32 %v930_v16, %v901_v17 }
 0x83d   :  { %v1128_v19 = vpop.f32.mrf.mxu1 }
 0x83e   :  { %906 = vst.msk [vmem:[%s1444_s7] sm:$0xff] %vm905_vm4, %v902_v18 }
 0x83f   :  { %911 = vsyncpa [#allocation3], 1 }
 0x840   :  { %912 = vsyncpa [#allocation5], 1 }

</bundles_post_ra>
